<compile_context>
chip_gen: v5e
topology: v5e:2x2
jax: 0.10.0
libtpu: 0.0.40
codegen_flags: <defaults>
</compile_context>

<pallas_src>
import functools

import jax
import jax.numpy as jnp
from jax.experimental import pallas as pl
from jax.experimental.pallas import tpu as pltpu

HIDDEN = 50
TILE_B = 512  # batch tile (multiple of 8); ~85% of HBM roofline per tiling data


def _dot_bf16(a, w_ref):
    # bf16 operands on the MXU, f32 accumulation.
    return jnp.dot(a.astype(jnp.bfloat16), w_ref[...].astype(jnp.bfloat16),
                   preferred_element_type=jnp.float32)


def _mlp_logits(x_ref, w1_ref, b1_ref, w2_ref, b2_ref, w3_ref, b3_ref,
                w4_ref, b4_ref):
    x = x_ref[...]
    h = jnp.tanh(_dot_bf16(x, w1_ref) + b1_ref[...])
    h = jnp.tanh(_dot_bf16(h, w2_ref) + b2_ref[...])
    h = jnp.tanh(_dot_bf16(h, w3_ref) + b3_ref[...])
    return _dot_bf16(h, w4_ref) + b4_ref[...]


def _mean_kernel(x_ref, w1_ref, b1_ref, w2_ref, b2_ref, w3_ref, b3_ref,
                 w4_ref, b4_ref, mean_ref):
    logits = _mlp_logits(x_ref, w1_ref, b1_ref, w2_ref, b2_ref, w3_ref, b3_ref,
                         w4_ref, b4_ref)
    mean_ref[...] = logits.astype(mean_ref.dtype)


def _probs_kernel(x_ref, w1_ref, b1_ref, w2_ref, b2_ref, w3_ref, b3_ref,
                  w4_ref, b4_ref, probs_ref):
    logits = _mlp_logits(x_ref, w1_ref, b1_ref, w2_ref, b2_ref, w3_ref, b3_ref,
                         w4_ref, b4_ref)
    # softmax over the action dim (matches F.softmax on a 2-D input).
    m = jnp.max(logits, axis=-1, keepdims=True)
    e = jnp.exp(logits - m)
    inv = pl.reciprocal(jnp.sum(e, axis=-1, keepdims=True), approx=False)
    probs_ref[...] = (e * inv).astype(probs_ref.dtype)


@functools.partial(jax.jit, static_argnames=("discrete",))
def _run_mlp(states, params, discrete):
    B, S = states.shape
    A = params["w4"].shape[1]

    # Pad batch to a multiple of 8 (sublane) and pick a tile size.
    pad_b = max(8, -(-B // 8) * 8)
    tile_b = min(TILE_B, pad_b)
    pad_b = -(-pad_b // tile_b) * tile_b
    if pad_b != B:
        states = jnp.pad(states, ((0, pad_b - B), (0, 0)))
    grid = (pad_b // tile_b,)

    x_spec = pl.BlockSpec((tile_b, S), lambda i: (i, 0))
    out_spec = pl.BlockSpec((tile_b, A), lambda i: (i, 0))

    def resident(shape):
        # Constant index map -> DMA'd once, stays resident across grid steps.
        return pl.BlockSpec(shape, lambda i: (0, 0))

    in_specs = [x_spec]
    weight_args = []
    for k in range(1, 5):
        w, b = params[f"w{k}"], params[f"b{k}"]
        in_specs += [resident(w.shape), resident(b.shape)]
        weight_args += [w, b]

    # Advisory cost estimate for XLA scheduling.
    flops = 2 * pad_b * (S * HIDDEN + 2 * HIDDEN * HIDDEN + HIDDEN * A)
    trans = pad_b * (3 * HIDDEN + (A if discrete else 0))  # tanh (+ exp)
    param_elems = sum(int(params[f"w{k}"].size + params[f"b{k}"].size)
                      for k in range(1, 5))
    bytes_acc = 4 * (pad_b * S + pad_b * A + param_elems)

    kernel = _probs_kernel if discrete else _mean_kernel
    out = pl.pallas_call(
        kernel,
        out_shape=jax.ShapeDtypeStruct((pad_b, A), jnp.float32),
        grid=grid,
        in_specs=in_specs,
        out_specs=out_spec,
        compiler_params=pltpu.CompilerParams(
            dimension_semantics=("parallel",)),
        cost_estimate=pl.CostEstimate(flops=int(flops),
                                      transcendentals=int(trans),
                                      bytes_accessed=int(bytes_acc)),
    )(states, *weight_args)
    return out[:B]


def policy_forward(states, params, discrete):
    """Returns the distribution parameters the PyTorch module would wrap.

    discrete:   {"probs": (B, A)}                  -> Categorical(probs)
    continuous: {"mean": (B, A), "cov": (A, A)}    -> MultivariateNormal
    """
    if discrete:
        return {"probs": _run_mlp(states, params, discrete=True)}
    mean = _run_mlp(states, params, discrete=False)
    std = jnp.exp(params["log_std"])                       # (A,)
    cov = jnp.eye(params["log_std"].shape[0], dtype=jnp.float32) * std ** 2
    return {"mean": mean, "cov": cov}


def init_params(key, state_dim, action_dim):
    """Deterministic init matching torch.nn.Linear default (uniform +-1/sqrt(fan_in))."""
    dims = [state_dim, HIDDEN, HIDDEN, HIDDEN, action_dim]
    params = {}
    for i in range(4):
        fan_in, fan_out = dims[i], dims[i + 1]
        key, kw, kb = jax.random.split(key, 3)
        bound = 1.0 / jnp.sqrt(jnp.float32(fan_in))
        # stored as (in, out) so the kernel does x @ W
        params[f"w{i+1}"] = jax.random.uniform(
            kw, (fan_in, fan_out), jnp.float32, -bound, bound)
        # biases kept 2-D (1, out) for clean VMEM layout / broadcasting
        params[f"b{i+1}"] = jax.random.uniform(
            kb, (1, fan_out), jnp.float32, -bound, bound)
    params["log_std"] = jnp.zeros((action_dim,), jnp.float32)
    return params


if __name__ == "__main__":
    B, STATE_DIM, ACTION_DIM = 8, 16, 4

    key = jax.random.PRNGKey(0)
    kp, kx = jax.random.split(key)
    params = init_params(kp, STATE_DIM, ACTION_DIM)
    states = jax.random.normal(kx, (B, STATE_DIM), jnp.float32)

    # discrete branch: Categorical probs
    disc = policy_forward(states, params, discrete=True)
    # continuous branch: MultivariateNormal mean + diagonal covariance
    cont = policy_forward(states, params, discrete=False)

    jax.block_until_ready((disc["probs"], cont["mean"], cont["cov"]))

    # references: (a) same bf16-operand math as the kernel, (b) pure-f32 sanity
    def ref_mlp(x, p, bf16):
        def d(a, w):
            if bf16:
                return jnp.dot(a.astype(jnp.bfloat16), w.astype(jnp.bfloat16),
                               preferred_element_type=jnp.float32)
            return jnp.dot(a, w, preferred_element_type=jnp.float32)
        h = jnp.tanh(d(x, p["w1"]) + p["b1"])
        h = jnp.tanh(d(h, p["w2"]) + p["b2"])
        h = jnp.tanh(d(h, p["w3"]) + p["b3"])
        return d(h, p["w4"]) + p["b4"]

    logits_bf16 = ref_mlp(states, params, bf16=True)
    probs_bf16 = jax.nn.softmax(logits_bf16, axis=-1)
    logits_f32 = ref_mlp(states, params, bf16=False)

    assert jnp.allclose(cont["mean"], logits_bf16, atol=2e-3, rtol=2e-3), \
        "mean mismatch vs bf16-matched reference"
    assert jnp.allclose(disc["probs"], probs_bf16, atol=2e-3, rtol=2e-3), \
        "probs mismatch vs bf16-matched reference"
    # loose sanity check that bf16 MXU operands did not change the math materially
    assert jnp.allclose(cont["mean"], logits_f32, atol=3e-2), \
        "mean drifted too far from f32 reference"
    assert jnp.allclose(jnp.sum(disc["probs"], axis=-1), 1.0, atol=1e-5), \
        "probs do not sum to 1"
    assert cont["cov"].shape == (ACTION_DIM, ACTION_DIM)

    print("KERNEL_OK")
</pallas_src>

<mosaic_0001>
module attributes {stable_mosaic.version = 11 : i64} {
  func.func @_probs_kernel(%arg0: i32, %arg1: memref<8x16xf32, #tpu.memory_space<vmem>>, %arg2: memref<16x50xf32, #tpu.memory_space<vmem>>, %arg3: memref<1x50xf32, #tpu.memory_space<vmem>>, %arg4: memref<50x50xf32, #tpu.memory_space<vmem>>, %arg5: memref<1x50xf32, #tpu.memory_space<vmem>>, %arg6: memref<50x50xf32, #tpu.memory_space<vmem>>, %arg7: memref<1x50xf32, #tpu.memory_space<vmem>>, %arg8: memref<50x4xf32, #tpu.memory_space<vmem>>, %arg9: memref<1x4xf32, #tpu.memory_space<vmem>>, %arg10: memref<8x4xf32, #tpu.memory_space<vmem>>) attributes {dimension_semantics = [#tpu.dimension_semantics<parallel>], iteration_bounds = array<i64: 1>, scalar_prefetch = 0 : i64, scratch_operands = 0 : i64, tpu.core_type = #tpu.core_type<tc>, window_params = [{transform_indices = @transform_0, window_bounds = array<i64: 8, 16>}, {pipeline_mode = #tpu.pipeline_mode<synchronous>, transform_indices = @transform_1, window_bounds = array<i64: 16, 50>}, {pipeline_mode = #tpu.pipeline_mode<synchronous>, transform_indices = @transform_2, window_bounds = array<i64: 1, 50>}, {pipeline_mode = #tpu.pipeline_mode<synchronous>, transform_indices = @transform_3, window_bounds = array<i64: 50, 50>}, {pipeline_mode = #tpu.pipeline_mode<synchronous>, transform_indices = @transform_4, window_bounds = array<i64: 1, 50>}, {pipeline_mode = #tpu.pipeline_mode<synchronous>, transform_indices = @transform_5, window_bounds = array<i64: 50, 50>}, {pipeline_mode = #tpu.pipeline_mode<synchronous>, transform_indices = @transform_6, window_bounds = array<i64: 1, 50>}, {pipeline_mode = #tpu.pipeline_mode<synchronous>, transform_indices = @transform_7, window_bounds = array<i64: 50, 4>}, {pipeline_mode = #tpu.pipeline_mode<synchronous>, transform_indices = @transform_8, window_bounds = array<i64: 1, 4>}, {transform_indices = @transform_9, window_bounds = array<i64: 8, 4>}]} {
    %c0 = arith.constant 0 : index
    %c0_0 = arith.constant 0 : index
    %0 = vector.load %arg1[%c0, %c0_0] : memref<8x16xf32, #tpu.memory_space<vmem>>, vector<8x16xf32>
    %1 = arith.truncf %0 : vector<8x16xf32> to vector<8x16xbf16>
    %c0_1 = arith.constant 0 : index
    %c0_2 = arith.constant 0 : index
    %2 = vector.load %arg2[%c0_1, %c0_2] : memref<16x50xf32, #tpu.memory_space<vmem>>, vector<16x50xf32>
    %3 = arith.truncf %2 : vector<16x50xf32> to vector<16x50xbf16>
    %cst = arith.constant dense<0.000000e+00> : vector<8x50xf32>
    %4 = tpu.matmul %1, %3, %cst {dimension_numbers = #tpu.dot_dimension_numbers<[1], [0], [0], [1], [0, 0, 1, 1], [], []>} : vector<8x16xbf16>, vector<16x50xbf16>, vector<8x50xf32> -> vector<8x50xf32>
    %c0_3 = arith.constant 0 : index
    %c0_4 = arith.constant 0 : index
    %5 = vector.load %arg3[%c0_3, %c0_4] : memref<1x50xf32, #tpu.memory_space<vmem>>, vector<1x50xf32>
    %6 = vector.broadcast %5 : vector<1x50xf32> to vector<8x50xf32>
    %7 = arith.addf %4, %6 : vector<8x50xf32>
    %8 = math.tanh %7 : vector<8x50xf32>
    %9 = arith.truncf %8 : vector<8x50xf32> to vector<8x50xbf16>
    %c0_5 = arith.constant 0 : index
    %c0_6 = arith.constant 0 : index
    %10 = vector.load %arg4[%c0_5, %c0_6] : memref<50x50xf32, #tpu.memory_space<vmem>>, vector<50x50xf32>
    %11 = arith.truncf %10 : vector<50x50xf32> to vector<50x50xbf16>
    %cst_7 = arith.constant dense<0.000000e+00> : vector<8x50xf32>
    %12 = tpu.matmul %9, %11, %cst_7 {dimension_numbers = #tpu.dot_dimension_numbers<[1], [0], [0], [1], [0, 0, 1, 1], [], []>} : vector<8x50xbf16>, vector<50x50xbf16>, vector<8x50xf32> -> vector<8x50xf32>
    %c0_8 = arith.constant 0 : index
    %c0_9 = arith.constant 0 : index
    %13 = vector.load %arg5[%c0_8, %c0_9] : memref<1x50xf32, #tpu.memory_space<vmem>>, vector<1x50xf32>
    %14 = vector.broadcast %13 : vector<1x50xf32> to vector<8x50xf32>
    %15 = arith.addf %12, %14 : vector<8x50xf32>
    %16 = math.tanh %15 : vector<8x50xf32>
    %17 = arith.truncf %16 : vector<8x50xf32> to vector<8x50xbf16>
    %c0_10 = arith.constant 0 : index
    %c0_11 = arith.constant 0 : index
    %18 = vector.load %arg6[%c0_10, %c0_11] : memref<50x50xf32, #tpu.memory_space<vmem>>, vector<50x50xf32>
    %19 = arith.truncf %18 : vector<50x50xf32> to vector<50x50xbf16>
    %cst_12 = arith.constant dense<0.000000e+00> : vector<8x50xf32>
    %20 = tpu.matmul %17, %19, %cst_12 {dimension_numbers = #tpu.dot_dimension_numbers<[1], [0], [0], [1], [0, 0, 1, 1], [], []>} : vector<8x50xbf16>, vector<50x50xbf16>, vector<8x50xf32> -> vector<8x50xf32>
    %c0_13 = arith.constant 0 : index
    %c0_14 = arith.constant 0 : index
    %21 = vector.load %arg7[%c0_13, %c0_14] : memref<1x50xf32, #tpu.memory_space<vmem>>, vector<1x50xf32>
    %22 = vector.broadcast %21 : vector<1x50xf32> to vector<8x50xf32>
    %23 = arith.addf %20, %22 : vector<8x50xf32>
    %24 = math.tanh %23 : vector<8x50xf32>
    %25 = arith.truncf %24 : vector<8x50xf32> to vector<8x50xbf16>
    %c0_15 = arith.constant 0 : index
    %c0_16 = arith.constant 0 : index
    %26 = vector.load %arg8[%c0_15, %c0_16] : memref<50x4xf32, #tpu.memory_space<vmem>>, vector<50x4xf32>
    %27 = arith.truncf %26 : vector<50x4xf32> to vector<50x4xbf16>
    %cst_17 = arith.constant dense<0.000000e+00> : vector<8x4xf32>
    %28 = tpu.matmul %25, %27, %cst_17 {dimension_numbers = #tpu.dot_dimension_numbers<[1], [0], [0], [1], [0, 0, 1, 1], [], []>} : vector<8x50xbf16>, vector<50x4xbf16>, vector<8x4xf32> -> vector<8x4xf32>
    %c0_18 = arith.constant 0 : index
    %c0_19 = arith.constant 0 : index
    %29 = vector.load %arg9[%c0_18, %c0_19] : memref<1x4xf32, #tpu.memory_space<vmem>>, vector<1x4xf32>
    %30 = vector.broadcast %29 : vector<1x4xf32> to vector<8x4xf32>
    %31 = arith.addf %28, %30 : vector<8x4xf32>
    %cst_20 = arith.constant dense<0xFF800000> : vector<8xf32>
    %32 = vector.multi_reduction <maximumf>, %31, %cst_20 [1] : vector<8x4xf32> to vector<8xf32>
    %33 = vector.shape_cast %32 : vector<8xf32> to vector<8x1xf32>
    %34 = vector.broadcast %33 : vector<8x1xf32> to vector<8x4xf32>
    %35 = arith.subf %31, %34 : vector<8x4xf32>
    %36 = math.exp %35 : vector<8x4xf32>
    %cst_21 = arith.constant dense<0.000000e+00> : vector<8xf32>
    %37 = vector.multi_reduction <add>, %36, %cst_21 [1] : vector<8x4xf32> to vector<8xf32>
    %38 = vector.shape_cast %37 : vector<8xf32> to vector<8x1xf32>
    %39 = tpu.reciprocal %38 : vector<8x1xf32> -> vector<8x1xf32>
    %40 = vector.broadcast %39 : vector<8x1xf32> to vector<8x4xf32>
    %41 = arith.mulf %36, %40 : vector<8x4xf32>
    %c0_22 = arith.constant 0 : index
    %c0_23 = arith.constant 0 : index
    %42 = vector.load %arg10[%c0_22, %c0_23] : memref<8x4xf32, #tpu.memory_space<vmem>>, vector<8x4xf32>
    tpu.vector_store %arg10[%c0_22, %c0_23], %41 {strides = array<i32>} : memref<8x4xf32, #tpu.memory_space<vmem>>, vector<8x4xf32>,
    return
  }
  func.func @transform_0(%arg0: i32) -> (i32, i32) {
    %c0_i32 = arith.constant 0 : i32
    %c0_i32_0 = arith.constant 0 : i32
    return %arg0, %c0_i32 : i32, i32
  }
  func.func @transform_1(%arg0: i32) -> (i32, i32) {
    %c0_i32 = arith.constant 0 : i32
    %c0_i32_0 = arith.constant 0 : i32
    %c0_i32_1 = arith.constant 0 : i32
    return %c0_i32, %c0_i32_0 : i32, i32
  }
  func.func @transform_2(%arg0: i32) -> (i32, i32) {
    %c0_i32 = arith.constant 0 : i32
    %c0_i32_0 = arith.constant 0 : i32
    %c0_i32_1 = arith.constant 0 : i32
    return %c0_i32, %c0_i32_0 : i32, i32
  }
  func.func @transform_3(%arg0: i32) -> (i32, i32) {
    %c0_i32 = arith.constant 0 : i32
    %c0_i32_0 = arith.constant 0 : i32
    %c0_i32_1 = arith.constant 0 : i32
    return %c0_i32, %c0_i32_0 : i32, i32
  }
  func.func @transform_4(%arg0: i32) -> (i32, i32) {
    %c0_i32 = arith.constant 0 : i32
    %c0_i32_0 = arith.constant 0 : i32
    %c0_i32_1 = arith.constant 0 : i32
    return %c0_i32, %c0_i32_0 : i32, i32
  }
  func.func @transform_5(%arg0: i32) -> (i32, i32) {
    %c0_i32 = arith.constant 0 : i32
    %c0_i32_0 = arith.constant 0 : i32
    %c0_i32_1 = arith.constant 0 : i32
    return %c0_i32, %c0_i32_0 : i32, i32
  }
  func.func @transform_6(%arg0: i32) -> (i32, i32) {
    %c0_i32 = arith.constant 0 : i32
    %c0_i32_0 = arith.constant 0 : i32
    %c0_i32_1 = arith.constant 0 : i32
    return %c0_i32, %c0_i32_0 : i32, i32
  }
  func.func @transform_7(%arg0: i32) -> (i32, i32) {
    %c0_i32 = arith.constant 0 : i32
    %c0_i32_0 = arith.constant 0 : i32
    %c0_i32_1 = arith.constant 0 : i32
    return %c0_i32, %c0_i32_0 : i32, i32
  }
  func.func @transform_8(%arg0: i32) -> (i32, i32) {
    %c0_i32 = arith.constant 0 : i32
    %c0_i32_0 = arith.constant 0 : i32
    %c0_i32_1 = arith.constant 0 : i32
    return %c0_i32, %c0_i32_0 : i32, i32
  }
  func.func @transform_9(%arg0: i32) -> (i32, i32) {
    %c0_i32 = arith.constant 0 : i32
    %c0_i32_0 = arith.constant 0 : i32
    return %arg0, %c0_i32 : i32, i32
  }
}

</mosaic_0001>

<bundles_post_ra>
// kernel: _run_mlp.1
= control target key start
LH: loop header
LB: loop body
LE: loop exit
PB: predicated region body
PF: predicated region fallthrough
CT: control target
= control target key end

     0   :  { %14 = vsyncpa [#allocation3], 0  ;;  %s557_s0 = inlined_call_operand.vmem [shape: f32[8,16], index: 0, kind: input, shape index: {}]   ;;  %s558_s1 = inlined_call_operand.hbm [shape: f32[16,50], index: 1, kind: input, shape index: {}]   ;;  %s559_s2 = inlined_call_operand.vmem [shape: f32[1,50], index: 2, kind: input, shape index: {}]   ;;  %s560_s3 = inlined_call_operand.vmem [shape: f32[50,50], index: 3, kind: input, shape index: {}]   ;;  %s561_s4 = inlined_call_operand.hbm [shape: f32[1,50], index: 4, kind: input, shape index: {}]   ;;  %s562_s5 = inlined_call_operand.hbm [shape: f32[50,50], index: 5, kind: input, shape index: {}]   ;;  %s563_s6 = inlined_call_operand.hbm [shape: f32[1,50], index: 6, kind: input, shape index: {}]   ;;  %s564_s7 = inlined_call_operand.vmem [shape: f32[50,4], index: 7, kind: input, shape index: {}]   ;;  %s565_s8 = inlined_call_operand.hbm [shape: f32[1,4], index: 8, kind: input, shape index: {}]   ;;  %s566_s9 = inlined_call_operand.vmem [shape: f32[8,4], index: 9, kind: output, shape index: {}]  }
   0x1   :  { %15 = vsyncpa [#allocation5], 0  ;;  %s41_s11 = sshll.u32 %s561_s4, 4  ;;  %s42_s11 = int_to_ptr.hbm [resolvable:$true] %s41_s11 }
   0x2   :  { %16 = vsyncpa [#allocation8], 0  ;;  %s425_s12 = smov [#allocation4]   ;;  %s65_s16 = sshll.u32 %s563_s6, 4  ;;  %s66_s16 = int_to_ptr.hbm [resolvable:$true] %s65_s16 }
   0x3   :  { %s43_s13 = sshll.u32 %s425_s12, 4  ;;  %s426_s17 = smov [#allocation7]   ;;  %s44_s13 = int_to_ptr.vmem [resolvable:$true] %s43_s13 }
   0x4   :  { %46 = dma.hbm_to_vmem [thread:$0]  %s42_s11, 16, %s44_s13, [#allocation5]  }
   0x5   :  { %s67_s18 = sshll.u32 %s426_s17, 4  ;;  %s23_s21 = sshll.u32 %s558_s1, 4  ;;  %s68_s18 = int_to_ptr.vmem [resolvable:$true] %s67_s18  ;;  %s24_s21 = int_to_ptr.hbm [resolvable:$true] %s23_s21 }
   0x6   :  { %70 = dma.hbm_to_vmem [thread:$0]  %s66_s16, 16, %s68_s18, [#allocation8]  }
   0x7   :  { %s427_s4 = smov [#allocation2]   ;;  %s51_s25 = sshll.u32 %s562_s5, 4  ;;  %s52_s25 = int_to_ptr.hbm [resolvable:$true] %s51_s25 }
   0x8   :  { %s25_s22 = sshll.u32 %s427_s4, 4  ;;  %s428_s26 = smov 128   ;;  %s26_s22 = int_to_ptr.vmem [resolvable:$true] %s25_s22 }
   0x9   :  { %s429_s6 = smov 8   ;;  %s430_s27 = smov [#allocation6]  }
   0xa   :  { %31 = dma.hbm_to_vmem [thread:$0]  %s24_s21, 256, %s26_s22, [#allocation3], %s428_s26, %s428_s26, %s429_s6  }
   0xb   :  { %s53_s28 = sshll.u32 %s430_s27, 4  ;;  %s78_s1 = sshll.u32 %s565_s8, 4  ;;  %s54_s28 = int_to_ptr.vmem [resolvable:$true] %s53_s28  ;;  %s79_s1 = int_to_ptr.hbm [resolvable:$true] %s78_s1 }
   0xc   :  { %59 = dma.hbm_to_vmem [thread:$0]  %s52_s25, 896, %s54_s28, [#allocation5], %s428_s26, %s428_s26, %s429_s6  }
   0xd   :  { %s431_s10 = smov [#allocation9]  }
   0xe   :  { %s80_s11 = sshll.u32 %s431_s10, 4  ;;  %s81_s11 = int_to_ptr.vmem [resolvable:$true] %s80_s11 }
   0xf   :  { %83 = dma.hbm_to_vmem [thread:$0]  %s79_s1, 16, %s81_s11, [#allocation8]  }
  0x10   :  { %419 = dma.done.wait [#allocation3], 256  }
  0x11   :  { %420 = vsyncadd [#allocation3], 4294967040 }
  0x12   :  { %421 = dma.done.wait [#allocation5], 912  }
  0x13   :  { %422 = vsyncadd [#allocation5], 4294966384 }
  0x14   :  { %423 = dma.done.wait [#allocation8], 32  }
  0x15   :  { %424 = vsyncadd [#allocation8], 4294967264  ;;  %v107_v0 = vld [vmem:[#allocation2] sm:$0xff]  ;;  %v108_v1 = vld [vmem:[#allocation2 + $0x8] sm:$0xff]  ;;  %vm152_vm0 = vcmask 1040384   ;;  %vm114_vm1 = vcmask 130048  }
  0x16   :  { %v105_v2 = vld [vmem:[%s557_s0] sm:$0xff]  ;;  %v109_v3 = vpack.c.bf16 %v108_v1, %v107_v0  ;;  %v139_v4 = vld [vmem:[%s560_s3 + $0x30] sm:$0x3]  ;;  %v138_v9 = vld [vmem:[%s560_s3 + $0x28] sm:$0xff]  ;;  %vm148_vm2 = vcmask 408576   ;;  %vm241_vm3 = vcmask 31744  }
  0x17   :  { %v106_v5 = vpack.c.bf16 %v105_v2, %v105_v2  ;;  %v143_v6 = vpack.c.bf16 %v139_v4, %v139_v4  ;;  %v137_v8 = vld [vmem:[%s560_s3 + $0x20] sm:$0xff]  ;;  %v135_v11 = vld [vmem:[%s560_s3 + $0x10] sm:$0xff]  ;;  %v136_v12 = vld [vmem:[%s560_s3 + $0x18] sm:$0xff] }
  0x18   :  { %125 = vmatpush.bf16.msra.mxu0 %v109_v3  ;;  %v142_v10 = vpack.c.bf16 %v138_v9, %v137_v8  ;;  %v141_v13 = vpack.c.bf16 %v136_v12, %v135_v11  ;;  %v133_v14 = vld [vmem:[%s560_s3] sm:$0xff]  ;;  %v134_v15 = vld [vmem:[%s560_s3 + $0x8] sm:$0xff]  ;;  %v175_v26 = vld [vmem:[#allocation6 + $0x20] sm:$0xff] }
  0x19   :  { %v154_v7 = vsel %vm152_vm0, %v143_v6, 0  ;;  %v140_v16 = vpack.c.bf16 %v134_v15, %v133_v14  ;;  %v177_v17 = vld [vmem:[#allocation6 + $0x30] sm:$0x3]  ;;  %v285_v20 = vld [vmem:[%s559_s2] ss:$0 sm:$0xff]  ;;  %v174_v30 = vld [vmem:[#allocation6 + $0x18] sm:$0xff] }
  0x1a   :  { %160 = vmatpush.bf16.msra.mxu1 %v154_v7  ;;  %v181_v18 = vpack.c.bf16 %v177_v17, %v177_v17  ;;  %v176_v27 = vld [vmem:[#allocation6 + $0x28] sm:$0xff]  ;;  %v173_v29 = vld [vmem:[#allocation6 + $0x10] sm:$0xff]  ;;  %v171_v32 = vld [vmem:[#allocation6] sm:$0xff] }
  0x1b   :  { %274 = vmatmul.msk.bf16.vlgmr.msra.gmra.mxu0 %vm114_vm1, %v106_v5  ;;  %v180_v28 = vpack.c.bf16 %v176_v27, %v175_v26  ;;  %v179_v31 = vpack.c.bf16 %v174_v30, %v173_v29  ;;  %v172_v33 = vld [vmem:[#allocation6 + $0x8] sm:$0xff]  ;;  %v213_v35 = vld [vmem:[%s564_s7 + $0x30] sm:$0x3]  ;;  %v212_v45 = vld [vmem:[%s564_s7 + $0x28] sm:$0xff] }
  0x1c   :  { %v190_v19 = vsel %vm152_vm0, %v181_v18, 0  ;;  %v178_v34 = vpack.c.bf16 %v172_v33, %v171_v32  ;;  %v217_v36 = vpack.c.bf16 %v213_v35, %v213_v35  ;;  %v286_v38 = vld [vmem:[#allocation4] ss:$0 sm:$0xff]  ;;  %v211_v44 = vld [vmem:[%s564_s7 + $0x20] sm:$0xff]  ;;  %v210_v48 = vld [vmem:[%s564_s7 + $0x18] sm:$0xff] }
  0x1d   :  { %196 = vmatpush.bf16.msra.mxu2 %v190_v19  ;;  %v216_v46 = vpack.c.bf16 %v212_v45, %v211_v44  ;;  %v209_v47 = vld [vmem:[%s564_s7 + $0x10] sm:$0xff]  ;;  %v207_v50 = vld [vmem:[%s564_s7] sm:$0xff]  ;;  %v208_v51 = vld [vmem:[%s564_s7 + $0x8] sm:$0xff] }
  0x1e   :  { %161 = vmatpush.bf16.msra.mxu1 %v142_v10  ;;  %v226_v37 = vsel %vm152_vm0, %v217_v36, 0  ;;  %v215_v49 = vpack.c.bf16 %v210_v48, %v209_v47  ;;  %v214_v52 = vpack.c.bf16 %v208_v51, %v207_v50  ;;  %v287_v53 = vld [vmem:[#allocation7] ss:$0 sm:$0xff]  ;;  %v288_v59 = vld [vmem:[#allocation9] ss:$0 sm:$0xff] }
  0x1f   :  { %232 = vmatpush.bf16.msra.mxu3 %v226_v37 }
  0x21   :  { %197 = vmatpush.bf16.msra.mxu2 %v180_v28 }
  0x22   :  { %162 = vmatpush.bf16.msra.mxu1 %v141_v13 }
  0x23   :  { %233 = vmatpush.bf16.msra.mxu3 %v216_v46 }
  0x25   :  { %198 = vmatpush.bf16.msra.mxu2 %v179_v31 }
  0x26   :  { %163 = vmatpush.bf16.msra.mxu1 %v140_v16 }
  0x27   :  { %234 = vmatpush.bf16.msra.mxu3 %v215_v49 }
  0x29   :  { %199 = vmatpush.bf16.msra.mxu2 %v178_v34 }
  0x2b   :  { %235 = vmatpush.bf16.msra.mxu3 %v214_v52 }
  0x98   :  { %v127_v21 = vpop.f32.mrf.mxu0 }
  0x99   :  { %v128_v22 = vadd.f32 %v285_v20, %v127_v21 }
  0x9b   :  { %289 = vtanh.f32 %v128_v22 }
  0xa0   :  { %v129_v23 = vpop.f32.mrf.mxu0 }
  0xa1   :  { %v290_v24 = vpop.eup %289 }
  0xa2   :  { %v132_v25 = vpack.c.bf16 %v290_v24, %v290_v24 }
  0xa4   :  { %275 = vmatmul.msk.bf16.vlgmr.msra.gmra.mxu1 %vm148_vm2, %v132_v25 }
 0x121   :  { %v165_v39 = vpop.f32.mrf.mxu1 }
 0x122   :  { %v166_v40 = vadd.f32 %v286_v38, %v165_v39 }
 0x124   :  { %291 = vtanh.f32 %v166_v40 }
 0x129   :  { %v167_v41 = vpop.f32.mrf.mxu1 }
 0x12a   :  { %v292_v42 = vpop.eup %291 }
 0x12b   :  { %v170_v43 = vpack.c.bf16 %v292_v42, %v292_v42 }
 0x12d   :  { %276 = vmatmul.msk.bf16.vlgmr.msra.gmra.mxu2 %vm148_vm2, %v170_v43 }
 0x1b0   :  { %v201_v54 = vpop.f32.mrf.mxu2 }
 0x1b1   :  { %v202_v55 = vadd.f32 %v287_v53, %v201_v54 }
 0x1b3   :  { %293 = vtanh.f32 %v202_v55 }
 0x1b8   :  { %v203_v56 = vpop.f32.mrf.mxu2 }
 0x1b9   :  { %v294_v57 = vpop.eup %293 }
 0x1ba   :  { %v206_v58 = vpack.c.bf16 %v294_v57, %v294_v57 }
 0x1bc   :  { %277 = vmatmul.msk.bf16.vlgmr.msra.gmra.mxu3 %vm148_vm2, %v206_v58 }
 0x23f   :  { %v237_v60 = vpop.f32.mrf.mxu3 }
 0x240   :  { %v238_v61 = vadd.f32 %v288_v59, %v237_v60 }
 0x242   :  { %v242_v62 = vsel %vm241_vm3, %v238_v61, -inf }
 0x243   :  { %243 = vmax.xlane.f32.xlu0 %v242_v62 }
 0x247   :  { %v239_v63 = vpop.f32.mrf.mxu3 }
 0x2b6   :  { %v244_v0 = vpop.xlane.xlu0 %243 }
 0x2b7   :  { %v245_v1 = vsub.f32 %v238_v61, %v244_v0 }
 0x2b9   :  { %v246_v2 = vmul.f32 1.442695, %v245_v1 }
 0x2bb   :  { %295 = vpow2.f32 %v246_v2 }
 0x2c1   :  { %v296_v3 = vpop.eup %295 }
 0x2c2   :  { %v248_v4 = vsel %vm241_vm3, %v296_v3, 0.0 }
 0x2c3   :  { %249 = vadd.xlane.f32.xlu0 %v248_v4 }
 0x336   :  { %v250_v5 = vpop.xlane.xlu0 %249 }
 0x337   :  { %297 = vrcp.f32 %v250_v5  ;;  %v262_v9 = vand.u32 2147483648, %v250_v5  ;;  %v260_v11 = vand.u32 2147483647, %v250_v5  ;;  %vm256_vm5 = vweird.f32 %v250_v5 }
 0x339   :  { %v263_v13 = vor.u32 1.1754944e-38, %v262_v9  ;;  %vm261_vm7 = vcmp.eq.f32.partialorder %v260_v11, 8.507059e+37 }
 0x33d   :  { %v298_v6 = vpop.eup %297 }
 0x33e   :  { %v252_v7 = vmul.f32 %v298_v6, %v250_v5  ;;  %vm257_vm4 = vweird.f32 %v298_v6 }
 0x33f   :  { %vm258_vm6 = vmor %vm256_vm5, %vm257_vm4 }
 0x340   :  { %v253_v8 = vsub.f32 1.0, %v252_v7 }
 0x342   :  { %v254_v10 = vmul.f32 %v298_v6, %v253_v8 }
 0x344   :  { %v255_v12 = vadd.f32 %v298_v6, %v254_v10 }
 0x346   :  { %v259_v14 = vsel %vm258_vm6, %v298_v6, %v255_v12 }
 0x347   :  { %v264_v15 = vsel %vm261_vm7, %v263_v13, %v259_v14 }
 0x348   :  { %v265_v16 = vmul.f32 %v296_v3, %v264_v15 }
 0x34a   :  { %266 = vst.msk [vmem:[%s566_s9] sm:$0xff] %vm241_vm3, %v265_v16 }
 0x34b   :  { %271 = vsyncpa [#allocation3], 1 }
 0x34c   :  { %272 = vsyncpa [#allocation5], 1 }
 0x34d   :  { %273 = vsyncpa [#allocation8], 1 }

</bundles_post_ra>
